<compile_context>
chip_gen: v7x
topology: tpu7x:2x2x1
jax: 0.10.0
libtpu: 0.0.40
codegen_flags: <defaults>
</compile_context>

<pallas_src>
import jax
import jax.numpy as jnp
from jax.experimental import pallas as pl
from jax.experimental.pallas import tpu as pltpu


def _head_kernel(cls_ref, box_ref, area_ref,
                 w1c_ref, w1b_ref, w1a_ref, b1_ref,
                 w2_ref, b2_ref, o_ref):
    """Fused: (split-)linear_1 -> LeakyReLU -> linear_2 -> log_softmax."""
    # linear_1, with the concat fused away: x @ W1 == cls @ W1[:dc]
    #                                            + box @ W1[dc:dc+db]
    #                                            + area * W1[dc+db:]
    h = jnp.dot(cls_ref[...], w1c_ref[...], preferred_element_type=jnp.float32)
    h = h + jnp.dot(box_ref[...], w1b_ref[...], preferred_element_type=jnp.float32)
    # area has a single feature -> cheap VPU broadcast-multiply instead of a K=1 matmul.
    h = h + area_ref[...] * w1a_ref[...]
    h = h + b1_ref[...]

    # LeakyReLU (torch default negative_slope = 0.01), in f32.
    h = jnp.where(h > 0, h, 0.01 * h)

    # linear_2: bf16 MXU feed, f32 accumulate.
    logits = jnp.dot(h.astype(jnp.bfloat16), w2_ref[...],
                     preferred_element_type=jnp.float32)
    logits = logits + b2_ref[...]

    # Numerically stable LogSoftmax over the last dim (per-row, no padding involved).
    m = jnp.max(logits, axis=-1, keepdims=True)
    lse = jnp.log(jnp.sum(jnp.exp(logits - m), axis=-1, keepdims=True)) + m
    o_ref[...] = (logits - lse).astype(o_ref.dtype)


def classifier_head_forward(classifier_outputs, bounding_boxes, area, params,
                            *, max_tile_b=1024):
    """Batch-tiled Pallas call; weights stay resident in VMEM across grid steps."""
    w1, b1, w2, b2 = params

    B, d_cls = classifier_outputs.shape
    d_box = bounding_boxes.shape[1]
    d_area = area.shape[1]
    H = w1.shape[1]
    O = w2.shape[1]
    assert w1.shape[0] == d_cls + d_box + d_area

    # Split W1 rows once at trace time (tiny) -> the concat never materializes.
    w1_cls = w1[:d_cls].astype(jnp.bfloat16)                       # (d_cls, H)
    w1_box = w1[d_cls:d_cls + d_box].astype(jnp.bfloat16)          # (d_box, H)
    w1_area = w1[d_cls + d_box:].astype(jnp.float32)               # (d_area=1, H)
    w2_bf = w2.astype(jnp.bfloat16)                                # (H, O)
    b1_f = b1.astype(jnp.float32)                                  # (1, H)
    b2_f = b2.astype(jnp.float32)                                  # (1, O)

    # bf16 for the dominant streamed inputs (halves HBM read bytes); area is
    # tiny and used on the VPU, keep it f32.
    cls_bf = classifier_outputs.astype(jnp.bfloat16)
    box_bf = bounding_boxes.astype(jnp.bfloat16)
    area_f = area.astype(jnp.float32)

    # Batch tile: large (512-2048) for big B to hit HBM roofline; a single
    # full-batch block for small B. max_tile_b=1024 keeps double-buffered f32
    # tiles comfortably inside v7x's 64 MiB VMEM / v5e's 16 MiB scoped default.
    tile_b = B if B <= max_tile_b else max_tile_b
    grid = (pl.cdiv(B, tile_b),)

    return pl.pallas_call(
        _head_kernel,
        out_shape=jax.ShapeDtypeStruct((B, O), jnp.float32),
        grid=grid,
        in_specs=[
            # streamed activation tiles (pipelined over the batch grid)
            pl.BlockSpec((tile_b, d_cls), lambda i: (i, 0)),
            pl.BlockSpec((tile_b, d_box), lambda i: (i, 0)),
            pl.BlockSpec((tile_b, d_area), lambda i: (i, 0)),
            # resident weights / biases (same block every step -> no re-DMA)
            pl.BlockSpec((d_cls, H), lambda i: (0, 0)),
            pl.BlockSpec((d_box, H), lambda i: (0, 0)),
            pl.BlockSpec((d_area, H), lambda i: (0, 0)),
            pl.BlockSpec((1, H), lambda i: (0, 0)),
            pl.BlockSpec((H, O), lambda i: (0, 0)),
            pl.BlockSpec((1, O), lambda i: (0, 0)),
        ],
        out_specs=pl.BlockSpec((tile_b, O), lambda i: (i, 0)),
        compiler_params=pltpu.CompilerParams(
            # Batch tiles are independent -> shard across v7x's two TCs.
            dimension_semantics=("parallel",),
        ),
    )(cls_bf, box_bf, area_f, w1_cls, w1_box, w1_area, b1_f, w2_bf, b2_f)


def init_params(key, input_dim, inner_dim=128, output_dim=2):
    """Deterministic, torch.nn.Linear-like init (uniform +/- 1/sqrt(fan_in))."""
    fan1 = input_dim + 5
    k1, k2, k3, k4 = jax.random.split(key, 4)
    lim1 = 1.0 / jnp.sqrt(jnp.float32(fan1))
    lim2 = 1.0 / jnp.sqrt(jnp.float32(inner_dim))
    w1 = jax.random.uniform(k1, (fan1, inner_dim), jnp.float32, -lim1, lim1)
    b1 = jax.random.uniform(k2, (1, inner_dim), jnp.float32, -lim1, lim1)
    w2 = jax.random.uniform(k3, (inner_dim, output_dim), jnp.float32, -lim2, lim2)
    b2 = jax.random.uniform(k4, (1, output_dim), jnp.float32, -lim2, lim2)
    return w1, b1, w2, b2


def _reference(classifier_outputs, bounding_boxes, area, params):
    """Pure-JAX f32 reference for sanity check."""
    w1, b1, w2, b2 = params
    x = jnp.concatenate([classifier_outputs, bounding_boxes, area], axis=-1)
    h = x @ w1 + b1
    h = jnp.where(h > 0, h, 0.01 * h)
    logits = h @ w2 + b2
    return jax.nn.log_softmax(logits, axis=-1)


if __name__ == "__main__":
    input_dim, inner_dim, output_dim = 32, 128, 2
    batch = 8

    key = jax.random.PRNGKey(0)
    kp, kc, kb, ka = jax.random.split(key, 4)

    params = init_params(kp, input_dim, inner_dim, output_dim)
    classifier_outputs = jax.random.normal(kc, (batch, input_dim), jnp.float32)
    bounding_boxes = jax.random.uniform(kb, (batch, 4), jnp.float32)
    area = jax.random.uniform(ka, (batch, 1), jnp.float32)

    out = classifier_head_forward(classifier_outputs, bounding_boxes, area, params)
    out = jax.block_until_ready(out)

    ref = _reference(classifier_outputs, bounding_boxes, area, params)
    assert out.shape == (batch, output_dim)
    # bf16 MXU feed vs f32 reference -> loose-but-safe tolerance.
    assert jnp.allclose(out, ref, atol=2e-2, rtol=2e-2)

    print("KERNEL_OK")
</pallas_src>

<mosaic_0001>
module attributes {stable_mosaic.version = 11 : i64} {
  func.func @_head_kernel(%arg0: i32, %arg1: memref<8x32xbf16, #tpu.memory_space<vmem>>, %arg2: memref<8x4xbf16, #tpu.memory_space<vmem>>, %arg3: memref<8x1xf32, #tpu.memory_space<vmem>>, %arg4: memref<32x128xbf16, #tpu.memory_space<vmem>>, %arg5: memref<4x128xbf16, #tpu.memory_space<vmem>>, %arg6: memref<1x128xf32, #tpu.memory_space<vmem>>, %arg7: memref<1x128xf32, #tpu.memory_space<vmem>>, %arg8: memref<128x2xbf16, #tpu.memory_space<vmem>>, %arg9: memref<1x2xf32, #tpu.memory_space<vmem>>, %arg10: memref<8x2xf32, #tpu.memory_space<vmem>>) attributes {dimension_semantics = [#tpu.dimension_semantics<parallel>], iteration_bounds = array<i64: 1>, scalar_prefetch = 0 : i64, scratch_operands = 0 : i64, tpu.core_type = #tpu.core_type<tc>, window_params = [{transform_indices = @transform_0, window_bounds = array<i64: 8, 32>}, {transform_indices = @transform_1, window_bounds = array<i64: 8, 4>}, {transform_indices = @transform_2, window_bounds = array<i64: 8, 1>}, {pipeline_mode = #tpu.pipeline_mode<synchronous>, transform_indices = @transform_3, window_bounds = array<i64: 32, 128>}, {pipeline_mode = #tpu.pipeline_mode<synchronous>, transform_indices = @transform_4, window_bounds = array<i64: 4, 128>}, {pipeline_mode = #tpu.pipeline_mode<synchronous>, transform_indices = @transform_5, window_bounds = array<i64: 1, 128>}, {pipeline_mode = #tpu.pipeline_mode<synchronous>, transform_indices = @transform_6, window_bounds = array<i64: 1, 128>}, {pipeline_mode = #tpu.pipeline_mode<synchronous>, transform_indices = @transform_7, window_bounds = array<i64: 128, 2>}, {pipeline_mode = #tpu.pipeline_mode<synchronous>, transform_indices = @transform_8, window_bounds = array<i64: 1, 2>}, {transform_indices = @transform_9, window_bounds = array<i64: 8, 2>}]} {
    %c0 = arith.constant 0 : index
    %c0_0 = arith.constant 0 : index
    %0 = vector.load %arg1[%c0, %c0_0] : memref<8x32xbf16, #tpu.memory_space<vmem>>, vector<8x32xbf16>
    %c0_1 = arith.constant 0 : index
    %c0_2 = arith.constant 0 : index
    %1 = vector.load %arg4[%c0_1, %c0_2] : memref<32x128xbf16, #tpu.memory_space<vmem>>, vector<32x128xbf16>
    %cst = arith.constant dense<0.000000e+00> : vector<8x128xf32>
    %2 = tpu.matmul %0, %1, %cst {dimension_numbers = #tpu.dot_dimension_numbers<[1], [0], [0], [1], [0, 0, 1, 1], [], []>} : vector<8x32xbf16>, vector<32x128xbf16>, vector<8x128xf32> -> vector<8x128xf32>
    %c0_3 = arith.constant 0 : index
    %c0_4 = arith.constant 0 : index
    %3 = vector.load %arg2[%c0_3, %c0_4] : memref<8x4xbf16, #tpu.memory_space<vmem>>, vector<8x4xbf16>
    %c0_5 = arith.constant 0 : index
    %c0_6 = arith.constant 0 : index
    %4 = vector.load %arg5[%c0_5, %c0_6] : memref<4x128xbf16, #tpu.memory_space<vmem>>, vector<4x128xbf16>
    %cst_7 = arith.constant dense<0.000000e+00> : vector<8x128xf32>
    %5 = tpu.matmul %3, %4, %cst_7 {dimension_numbers = #tpu.dot_dimension_numbers<[1], [0], [0], [1], [0, 0, 1, 1], [], []>} : vector<8x4xbf16>, vector<4x128xbf16>, vector<8x128xf32> -> vector<8x128xf32>
    %6 = arith.addf %2, %5 : vector<8x128xf32>
    %c0_8 = arith.constant 0 : index
    %c0_9 = arith.constant 0 : index
    %7 = vector.load %arg3[%c0_8, %c0_9] : memref<8x1xf32, #tpu.memory_space<vmem>>, vector<8x1xf32>
    %c0_10 = arith.constant 0 : index
    %c0_11 = arith.constant 0 : index
    %8 = vector.load %arg6[%c0_10, %c0_11] : memref<1x128xf32, #tpu.memory_space<vmem>>, vector<1x128xf32>
    %9 = vector.broadcast %7 : vector<8x1xf32> to vector<8x128xf32>
    %10 = vector.broadcast %8 : vector<1x128xf32> to vector<8x128xf32>
    %11 = arith.mulf %9, %10 : vector<8x128xf32>
    %12 = arith.addf %6, %11 : vector<8x128xf32>
    %c0_12 = arith.constant 0 : index
    %c0_13 = arith.constant 0 : index
    %13 = vector.load %arg7[%c0_12, %c0_13] : memref<1x128xf32, #tpu.memory_space<vmem>>, vector<1x128xf32>
    %14 = vector.broadcast %13 : vector<1x128xf32> to vector<8x128xf32>
    %15 = arith.addf %12, %14 : vector<8x128xf32>
    %cst_14 = arith.constant 0.000000e+00 : f32
    %16 = vector.broadcast %cst_14 : f32 to vector<8x128xf32>
    %17 = arith.cmpf ogt, %15, %16 : vector<8x128xf32>
    %cst_15 = arith.constant 0.00999999977 : f32
    %18 = vector.broadcast %cst_15 : f32 to vector<8x128xf32>
    %19 = arith.mulf %18, %15 : vector<8x128xf32>
    %20 = arith.select %17, %15, %19 : vector<8x128xi1>, vector<8x128xf32>
    %21 = arith.truncf %20 : vector<8x128xf32> to vector<8x128xbf16>
    %c0_16 = arith.constant 0 : index
    %c0_17 = arith.constant 0 : index
    %22 = vector.load %arg8[%c0_16, %c0_17] : memref<128x2xbf16, #tpu.memory_space<vmem>>, vector<128x2xbf16>
    %cst_18 = arith.constant dense<0.000000e+00> : vector<8x2xf32>
    %23 = tpu.matmul %21, %22, %cst_18 {dimension_numbers = #tpu.dot_dimension_numbers<[1], [0], [0], [1], [0, 0, 1, 1], [], []>} : vector<8x128xbf16>, vector<128x2xbf16>, vector<8x2xf32> -> vector<8x2xf32>
    %c0_19 = arith.constant 0 : index
    %c0_20 = arith.constant 0 : index
    %24 = vector.load %arg9[%c0_19, %c0_20] : memref<1x2xf32, #tpu.memory_space<vmem>>, vector<1x2xf32>
    %25 = vector.broadcast %24 : vector<1x2xf32> to vector<8x2xf32>
    %26 = arith.addf %23, %25 : vector<8x2xf32>
    %cst_21 = arith.constant dense<0xFF800000> : vector<8xf32>
    %27 = vector.multi_reduction <maximumf>, %26, %cst_21 [1] : vector<8x2xf32> to vector<8xf32>
    %28 = vector.shape_cast %27 : vector<8xf32> to vector<8x1xf32>
    %29 = vector.broadcast %28 : vector<8x1xf32> to vector<8x2xf32>
    %30 = arith.subf %26, %29 : vector<8x2xf32>
    %31 = math.exp %30 : vector<8x2xf32>
    %cst_22 = arith.constant dense<0.000000e+00> : vector<8xf32>
    %32 = vector.multi_reduction <add>, %31, %cst_22 [1] : vector<8x2xf32> to vector<8xf32>
    %33 = vector.shape_cast %32 : vector<8xf32> to vector<8x1xf32>
    %34 = math.log %33 : vector<8x1xf32>
    %35 = arith.addf %34, %28 : vector<8x1xf32>
    %36 = vector.broadcast %35 : vector<8x1xf32> to vector<8x2xf32>
    %37 = arith.subf %26, %36 : vector<8x2xf32>
    %c0_23 = arith.constant 0 : index
    %c0_24 = arith.constant 0 : index
    %38 = vector.load %arg10[%c0_23, %c0_24] : memref<8x2xf32, #tpu.memory_space<vmem>>, vector<8x2xf32>
    tpu.vector_store %arg10[%c0_23, %c0_24], %37 {strides = array<i32>} : memref<8x2xf32, #tpu.memory_space<vmem>>, vector<8x2xf32>,
    return
  }
  func.func @transform_0(%arg0: i32) -> (i32, i32) {
    %c0_i32 = arith.constant 0 : i32
    %c0_i32_0 = arith.constant 0 : i32
    return %arg0, %c0_i32 : i32, i32
  }
  func.func @transform_1(%arg0: i32) -> (i32, i32) {
    %c0_i32 = arith.constant 0 : i32
    %c0_i32_0 = arith.constant 0 : i32
    return %arg0, %c0_i32 : i32, i32
  }
  func.func @transform_2(%arg0: i32) -> (i32, i32) {
    %c0_i32 = arith.constant 0 : i32
    %c0_i32_0 = arith.constant 0 : i32
    return %arg0, %c0_i32 : i32, i32
  }
  func.func @transform_3(%arg0: i32) -> (i32, i32) {
    %c0_i32 = arith.constant 0 : i32
    %c0_i32_0 = arith.constant 0 : i32
    %c0_i32_1 = arith.constant 0 : i32
    return %c0_i32, %c0_i32_0 : i32, i32
  }
  func.func @transform_4(%arg0: i32) -> (i32, i32) {
    %c0_i32 = arith.constant 0 : i32
    %c0_i32_0 = arith.constant 0 : i32
    %c0_i32_1 = arith.constant 0 : i32
    return %c0_i32, %c0_i32_0 : i32, i32
  }
  func.func @transform_5(%arg0: i32) -> (i32, i32) {
    %c0_i32 = arith.constant 0 : i32
    %c0_i32_0 = arith.constant 0 : i32
    %c0_i32_1 = arith.constant 0 : i32
    return %c0_i32, %c0_i32_0 : i32, i32
  }
  func.func @transform_6(%arg0: i32) -> (i32, i32) {
    %c0_i32 = arith.constant 0 : i32
    %c0_i32_0 = arith.constant 0 : i32
    %c0_i32_1 = arith.constant 0 : i32
    return %c0_i32, %c0_i32_0 : i32, i32
  }
  func.func @transform_7(%arg0: i32) -> (i32, i32) {
    %c0_i32 = arith.constant 0 : i32
    %c0_i32_0 = arith.constant 0 : i32
    %c0_i32_1 = arith.constant 0 : i32
    return %c0_i32, %c0_i32_0 : i32, i32
  }
  func.func @transform_8(%arg0: i32) -> (i32, i32) {
    %c0_i32 = arith.constant 0 : i32
    %c0_i32_0 = arith.constant 0 : i32
    %c0_i32_1 = arith.constant 0 : i32
    return %c0_i32, %c0_i32_0 : i32, i32
  }
  func.func @transform_9(%arg0: i32) -> (i32, i32) {
    %c0_i32 = arith.constant 0 : i32
    %c0_i32_0 = arith.constant 0 : i32
    return %arg0, %c0_i32 : i32, i32
  }
}

</mosaic_0001>

<bundles_post_ra>
// kernel: tpu_custom_call.1
= control target key start
LH: loop header
LB: loop body
LE: loop exit
PB: predicated region body
PF: predicated region fallthrough
CT: control target
= control target key end

     0   :  { %vm44_vm0 = vcmask 1041408   ;;  %v382_v0 = vmov 0.0   ;;  %vm383_vm1 = vmmov 0   ;;  %vm40_vm2 = vcmask 31744   ;;  %s495_s4 = inlined_call_operand.vmem [shape: bf16[4,128], index: 4, kind: input, shape index: {}]   ;;  %s496_s1 = inlined_call_operand.vmem [shape: bf16[8,4], index: 1, kind: input, shape index: {}]   ;;  %s497_s3 = inlined_call_operand.vmem [shape: bf16[32,128], index: 3, kind: input, shape index: {}]   ;;  %s498_s2 = inlined_call_operand.vmem [shape: f32[8,1], index: 2, kind: input, shape index: {}]   ;;  %s499_s7 = inlined_call_operand.vmem [shape: bf16[128,2], index: 7, kind: input, shape index: {}]   ;;  %s500_s0 = inlined_call_operand.vmem [shape: bf16[8,32], index: 0, kind: input, shape index: {}]   ;;  %s501_s5 = inlined_call_operand.vmem [shape: f32[1,128], index: 5, kind: input, shape index: {}]   ;;  %s502_s6 = inlined_call_operand.vmem [shape: f32[1,128], index: 6, kind: input, shape index: {}]   ;;  %s503_s8 = inlined_call_operand.vmem [shape: f32[1,2], index: 8, kind: input, shape index: {}]   ;;  %s504_s9 = inlined_call_operand.vmem [shape: f32[8,2], index: 9, kind: output, shape index: {}]  }
   0x1   :  { %330 = vmatprep.subr.bf16.mxu1 %v382_v0  ;;  %v39_v1 = vld [vmem:[%s495_s4] sm:$0x3]  ;;  %332 = vmatprep.mubr.msk.bf16.mxu1 %vm383_vm1, %v382_v0  ;;  %v384_v6 = vmov 0   ;;  %v369_v8 = vld [vmem:[%s497_s3 + $0x8] sm:$0xff]   ;;  %vm100_vm3 = vcmask 261120   ;;  %v372_v11 = vld [vmem:[%s499_s7 + $0x10] sm:$0xff]  }
   0x2   :  { %v46_v2 = vsel %vm44_vm0, %v39_v1, 0  ;;  %344 = vmatprep.subr.bf16.mxu0 %v382_v0  ;;  %360 = vmatprep.mubr.msk.bf16.mxu0 %vm383_vm1, %v382_v0  ;;  %v38_v3 = vld [vmem:[%s496_s1] sm:$0xf]  ;;  %v371_v9 = vld [vmem:[%s499_s7 + $0x8] sm:$0xff]   ;;  %v373_v12 = vld [vmem:[%s499_s7 + $0x18] sm:$0xff]   ;;  %vm282_vm5 = vcmask 15360  }
   0x3   :  { %331 = vmatpush3.bf16.msra.mxu1 %v46_v2  ;;  %v368_v4 = vld [vmem:[%s497_s3] sm:$0xff]   ;;  %367 = vset.pattern.permute.xlu0 %v384_v6  ;;  %v375_v14 = vld [vmem:[%s499_s7 + $0x28] sm:$0xff]   ;;  %v376_v15 = vld [vmem:[%s499_s7 + $0x30] sm:$0xff]  }
   0x4   :  { %336 = vmatprep.subr.bf16.mxu1 %v382_v0  ;;  %v144_v5 = vld [vmem:[%s498_s2] sm:$0xff]  ;;  %v377_v16 = vld [vmem:[%s499_s7 + $0x38] sm:$0xff]  }
   0x5   :  { %v370_v7 = vld [vmem:[%s499_s7] sm:$0xff]   ;;  %148 = vperm.xlu0 %367, %v144_v5  }
   0x6   :  { %333 = vmatmul.mubr.msk.bf16.vlgmr.msra.gmra.mrb[0].mxu1 %vm40_vm2, %v38_v3  ;;  %345 = vmatpush3.bf16.msra.mxu0 %v370_v7  ;;  %v33_v10 = vld [vmem:[%s500_s0] sm:$0xf] }
   0x7   :  { %337 = vmatpush3.bf16.msra.mxu1 %v368_v4  ;;  %340 = vmatprep.mubr.msk.bf16.mxu1 %vm383_vm1, %v382_v0  ;;  %v374_v13 = vld [vmem:[%s499_s7 + $0x20] sm:$0xff]  }
   0x8   :  { %338 = vmatprep.subr.bf16.mxu1 %v382_v0  ;;  %346 = vmatprep.subr.bf16.mxu0 %v382_v0  ;;  %v305_v21 = vld [vmem:[%s501_s5] ss:$0 sm:$0xff] }
   0x9   :  { %v306_v27 = vld [vmem:[%s502_s6] ss:$0 sm:$0xff] }
   0xa   :  { %347 = vmatpush3.bf16.msra.mxu0 %v371_v9  ;;  %v307_v35 = vld [vmem:[%s503_s8] ss:$0 sm:$0xff] }
   0xb   :  { %339 = vmatpush3.bf16.msra.mxu1 %v369_v8  ;;  %348 = vmatprep.subr.bf16.mxu0 %v382_v0 }
   0xe   :  { %341 = vmatmul.mubr.msk.bf16.vlgmr.msra.gmra.mrb[4].mxu1 %vm100_vm3, %v33_v10  ;;  %349 = vmatpush3.bf16.msra.mxu0 %v372_v11 }
   0xf   :  { %350 = vmatprep.subr.bf16.mxu0 %v382_v0 }
  0x12   :  { %351 = vmatpush3.bf16.msra.mxu0 %v373_v12 }
  0x13   :  { %352 = vmatprep.subr.bf16.mxu0 %v382_v0 }
  0x16   :  { %353 = vmatpush3.bf16.msra.mxu0 %v374_v13 }
  0x17   :  { %354 = vmatprep.subr.bf16.mxu0 %v382_v0 }
  0x1a   :  { %355 = vmatpush3.bf16.msra.mxu0 %v375_v14 }
  0x1b   :  { %356 = vmatprep.subr.bf16.mxu0 %v382_v0 }
  0x1e   :  { %357 = vmatpush3.bf16.msra.mxu0 %v376_v15 }
  0x1f   :  { %358 = vmatprep.subr.bf16.mxu0 %v382_v0 }
  0x22   :  { %359 = vmatpush3.bf16.msra.mxu0 %v377_v16 }
  0x84   :  { %v149_v22 = vpop.permute.xlu0 %148 }
  0x85   :  { %v157_v23 = vmul.f32 %v305_v21, %v149_v22 }
  0xd9   :  { %v82_v17 = vpop.f32.mrb[0].mxu1 }
  0xda   :  { %v334_v18 = vpop.f32.mrb[1].mxu1 }
  0xdb   :  { %v85_v19 = vpop.f32.mrb[2].mxu1 }
  0xdc   :  { %v335_v20 = vpop.f32.mrb[3].mxu1 }
  0xe1   :  { %v138_v24 = vpop.f32.mrb[4].mxu1 }
  0xe2   :  { %v139_v25 = vadd.f32 %v138_v24, %v82_v17  ;;  %v342_v26 = vpop.f32.mrb[5].mxu1 }
  0xe3   :  { %v141_v28 = vpop.f32.mrb[6].mxu1 }
  0xe4   :  { %v158_v29 = vadd.f32 %v157_v23, %v139_v25  ;;  %v343_v30 = vpop.f32.mrb[7].mxu1 }
  0xe6   :  { %v166_v31 = vadd.f32 %v306_v27, %v158_v29 }
  0xe8   :  { %vm167_vm4 = vcmp.gt.f32.partialorder %v166_v31, 0.0  ;;  %v168_v32 = vmul.f32 0.01, %v166_v31 }
  0xea   :  { %v169_v33 = vsel %vm167_vm4, %v166_v31, %v168_v32 }
  0xeb   :  { %v170_v34 = vpack.c.bf16 %v169_v33, %v169_v33 }
  0xed   :  { %361 = vmatmul.mubr.bf16.vlgmr.msra.gmra.mrb[0].mxu0 %v170_v34 }
 0x1c0   :  { %v276_v36 = vpop.f32.mrb[0].mxu0 }
 0x1c1   :  { %v277_v37 = vadd.f32 %v307_v35, %v276_v36  ;;  %v362_v38 = vpop.f32.mrb[1].mxu0 }
 0x1c2   :  { %v279_v39 = vpop.f32.mrb[2].mxu0 }
 0x1c3   :  { %v363_v40 = vpop.f32.mrb[3].mxu0  ;;  %v283_v41 = vsel %vm282_vm5, %v277_v37, -inf }
 0x1c4   :  { %284 = vmax.xlane.f32.xlu0 %v283_v41 }
 0x251   :  { %v285_v42 = vpop.xlane.xlu0 %284 }
 0x252   :  { %v286_v43 = vsub.f32 %v277_v37, %v285_v42 }
 0x254   :  { %v287_v44 = vmul.f32 1.442695, %v286_v43 }
 0x256   :  { %378 = vpow2.f32 %v287_v44 }
 0x260   :  { %v379_v45 = vpop.eup %378 }
 0x261   :  { %v289_v46 = vsel %vm282_vm5, %v379_v45, 0.0 }
 0x262   :  { %290 = vadd.xlane.f32.xlu1 %v289_v46 }
 0x2ef   :  { %v291_v47 = vpop.xlane.xlu1 %290 }
 0x2f0   :  { %380 = vlog2.f32 %v291_v47 }
 0x2fa   :  { %v381_v48 = vpop.eup %380 }
 0x2fb   :  { %v293_v49 = vmul.f32 0.6931472, %v381_v48 }
 0x2fd   :  { %v294_v50 = vadd.f32 %v293_v49, %v285_v42 }
 0x2ff   :  { %v295_v51 = vsub.f32 %v277_v37, %v294_v50 }
 0x301   :  { %296 = vst.msk [vmem:[%s504_s9] sm:$0xff] %vm282_vm5, %v295_v51 }

</bundles_post_ra>
